<compile_context>
chip_gen: v7x
topology: tpu7x:2x2x1
jax: 0.10.0
libtpu: 0.0.40
codegen_flags: <defaults>
</compile_context>

<pallas_src>
import math

import jax
import jax.numpy as jnp
from jax.experimental import pallas as pl
from jax.experimental.pallas import tpu as pltpu


def pool_kernel(cls_ref, patches_ref,
                w_cls_ref, b_cls_ref,
                w_dwe_ref, w_dwo_ref, b_dwe_ref, b_dwo_ref,
                w_pwe_ref, w_pwo_ref, b_pw_ref,
                cls_out_ref, tok_out_ref):
    # ---- cls feed-forward: (Bt, C) @ (C, 2C) + (1, 2C)  -> MXU ----
    cls_res = jnp.dot(cls_ref[:, 0, :], w_cls_ref[...],
                      preferred_element_type=jnp.float32) + b_cls_ref[...]
    cls_out_ref[:, 0, :] = cls_res.astype(cls_out_ref.dtype)

    # ---- depthwise 3x3 stride-2 conv (groups=C, out=2C) ----
    # Output channel 2c+j uses input channel c; split into even/odd output
    # channels so the 9-tap MAC runs at width C (no channel repeat).  -> VPU
    R = tok_out_ref.shape[0]            # Bt * P flattened token rows
    C = w_dwe_ref.shape[1]
    acc_e = jnp.zeros((R, C), jnp.float32)
    acc_o = jnp.zeros((R, C), jnp.float32)
    for k in range(9):                  # static unroll over the 3x3 taps
        tap = patches_ref[k]            # (R, C)
        acc_e = acc_e + tap * w_dwe_ref[k:k + 1, :]
        acc_o = acc_o + tap * w_dwo_ref[k:k + 1, :]
    dw_e = acc_e + b_dwe_ref[...]
    dw_o = acc_o + b_dwo_ref[...]

    # ---- pointwise 1x1 conv, split over even/odd dw channels  -> MXU ----
    pw = (jnp.dot(dw_e, w_pwe_ref[...], preferred_element_type=jnp.float32)
          + jnp.dot(dw_o, w_pwo_ref[...], preferred_element_type=jnp.float32)
          + b_pw_ref[...])
    tok_out_ref[...] = pw.astype(tok_out_ref.dtype)


def pool_forward(x, params, *, target_rows=128):
    B, N, C = x.shape
    h = int(math.isqrt(N - 1))
    assert h * h == N - 1, "token count must be a perfect square + 1"
    Ho = Wo = (h + 2 - 3) // 2 + 1      # k=3, stride=2, pad=1
    P = Ho * Wo
    C2 = 2 * C

    # Batch block size: fill the MXU M-dim toward target_rows, use all of B
    # when B is small; bt must divide B so blocks are exact.
    bt = min(B, max(1, target_rows // P))
    while B % bt:
        bt -= 1
    R = bt * P
    n_blocks = B // bt

    cls_tok = x[:, :1, :]                                   # (B, 1, C)
    tokens = x[:, 1:, :].reshape(B, h, h, C)                # channels-last image
    pad = jnp.pad(tokens, ((0, 0), (1, 1), (1, 1), (0, 0)))

    # width-C im2col in tap-major, flat-row layout: patches[k, b*P + p, c]
    # (no channel repeat -> half the HBM bytes of the previous version)
    taps = []
    for ki in range(3):
        for kj in range(3):
            taps.append(pad[:, ki:ki + 2 * Ho:2, kj:kj + 2 * Wo:2, :])
    patches = jnp.stack(taps, axis=0).reshape(9, B * P, C)

    grid_spec = pltpu.PrefetchScalarGridSpec(
        num_scalar_prefetch=0,
        grid=(n_blocks,),
        in_specs=[
            pl.BlockSpec((bt, 1, C), lambda i: (i, 0, 0)),    # cls tokens
            pl.BlockSpec((9, R, C), lambda i: (0, i, 0)),     # im2col patches
            pl.BlockSpec((C, C2), lambda i: (0, 0)),          # w_cls
            pl.BlockSpec((1, C2), lambda i: (0, 0)),          # b_cls
            pl.BlockSpec((9, C), lambda i: (0, 0)),           # w_dw even out-ch
            pl.BlockSpec((9, C), lambda i: (0, 0)),           # w_dw odd out-ch
            pl.BlockSpec((1, C), lambda i: (0, 0)),           # b_dw even
            pl.BlockSpec((1, C), lambda i: (0, 0)),           # b_dw odd
            pl.BlockSpec((C, C2), lambda i: (0, 0)),          # w_pw even rows
            pl.BlockSpec((C, C2), lambda i: (0, 0)),          # w_pw odd rows
            pl.BlockSpec((1, C2), lambda i: (0, 0)),          # b_pw
        ],
        out_specs=[
            pl.BlockSpec((bt, 1, C2), lambda i: (i, 0, 0)),   # cls out
            pl.BlockSpec((R, C2), lambda i: (i, 0)),          # token out (flat rows)
        ],
    )

    cls_out, tok_out = pl.pallas_call(
        pool_kernel,
        out_shape=(jax.ShapeDtypeStruct((B, 1, C2), x.dtype),
                   jax.ShapeDtypeStruct((B * P, C2), x.dtype)),
        grid_spec=grid_spec,
        compiler_params=pltpu.CompilerParams(dimension_semantics=("parallel",)),
    )(cls_tok, patches,
      params["w_cls"], params["b_cls"],
      params["w_dw_e"], params["w_dw_o"], params["b_dw_e"], params["b_dw_o"],
      params["w_pw_e"], params["w_pw_o"], params["b_pw"])

    return jnp.concatenate([cls_out, tok_out.reshape(B, P, C2)], axis=1)


def init_params(key, dim):
    """Deterministic synthetic parameters matching Pool(dim)."""
    C, C2 = dim, 2 * dim
    ks = jax.random.split(key, 6)
    w_cls = jax.random.normal(ks[0], (C, C2), jnp.float32) / math.sqrt(C)
    b_cls = jax.random.normal(ks[1], (1, C2), jnp.float32) * 0.01
    # depthwise conv weight, OIHW with groups=C: (2C, 1, 3, 3)
    w_dw_raw = jax.random.normal(ks[2], (C2, 1, 3, 3), jnp.float32) / 3.0
    b_dw = jax.random.normal(ks[3], (1, C2), jnp.float32) * 0.01
    # pointwise 1x1 conv weight, OIHW: (2C, 2C, 1, 1)
    w_pw_raw = jax.random.normal(ks[4], (C2, C2, 1, 1), jnp.float32) / math.sqrt(C2)
    b_pw = jax.random.normal(ks[5], (1, C2), jnp.float32) * 0.01

    # kernel-friendly layouts: split grouped-conv weights into even/odd output
    # channels so the kernel never needs a channel-repeat of the activations.
    w_dw_tap = jnp.transpose(w_dw_raw[:, 0, :, :], (1, 2, 0)).reshape(9, C2)  # [ki*3+kj, out]
    w_dw_e = w_dw_tap[:, 0::2]                 # (9, C)  out channel 2c
    w_dw_o = w_dw_tap[:, 1::2]                 # (9, C)  out channel 2c+1
    b_dw_e = b_dw[:, 0::2]                     # (1, C)
    b_dw_o = b_dw[:, 1::2]                     # (1, C)
    w_pw_t = jnp.transpose(w_pw_raw[:, :, 0, 0], (1, 0))    # (in=2C, out=2C)
    w_pw_e = w_pw_t[0::2, :]                   # (C, 2C) rows for even dw channels
    w_pw_o = w_pw_t[1::2, :]                   # (C, 2C) rows for odd dw channels

    return dict(w_cls=w_cls, b_cls=b_cls,
                w_dw_e=w_dw_e, w_dw_o=w_dw_o, b_dw_e=b_dw_e, b_dw_o=b_dw_o,
                w_pw_e=w_pw_e, w_pw_o=w_pw_o, b_pw=b_pw,
                w_dw_raw=w_dw_raw, b_dw=b_dw, w_pw_raw=w_pw_raw)


def pool_reference(x, params):
    """Pure-JAX reference (lax convolutions) replicating the PyTorch forward."""
    B, N, C = x.shape
    h = int(math.isqrt(N - 1))
    C2 = 2 * C
    cls_tok, tokens = x[:, :1, :], x[:, 1:, :]
    cls_out = cls_tok @ params["w_cls"] + params["b_cls"]
    t = tokens.reshape(B, h, h, C).transpose(0, 3, 1, 2)     # b (h w) c -> b c h w
    dw = jax.lax.conv_general_dilated(
        t, params["w_dw_raw"], window_strides=(2, 2), padding=((1, 1), (1, 1)),
        feature_group_count=C, dimension_numbers=("NCHW", "OIHW", "NCHW"))
    dw = dw + params["b_dw"][0][None, :, None, None]
    pw = jax.lax.conv_general_dilated(
        dw, params["w_pw_raw"], window_strides=(1, 1), padding="VALID",
        dimension_numbers=("NCHW", "OIHW", "NCHW"))
    pw = pw + params["b_pw"][0][None, :, None, None]
    out_tokens = pw.reshape(B, C2, -1).transpose(0, 2, 1)    # b c h w -> b (h w) c
    return jnp.concatenate([cls_out, out_tokens], axis=1)


if __name__ == "__main__":
    B, dim, h = 2, 16, 8                     # x: (B, 1 + h*h, dim) = (2, 65, 16)
    N = 1 + h * h
    key = jax.random.PRNGKey(0)
    kx, kp = jax.random.split(key)
    x = jax.random.normal(kx, (B, N, dim), jnp.float32)
    params = init_params(kp, dim)

    out = pool_forward(x, params)
    out = jax.block_until_ready(out)

    ref = pool_reference(x, params)
    assert out.shape == (B, 1 + (h // 2) ** 2, 2 * dim), out.shape
    err = float(jnp.max(jnp.abs(out - ref)))
    assert jnp.allclose(out, ref, atol=1e-4, rtol=1e-4), f"max abs err {err}"
    print("KERNEL_OK")
</pallas_src>

<mosaic_0001>
module attributes {stable_mosaic.version = 11 : i64} {
  func.func @pool_kernel(%arg0: i32, %arg1: memref<2x1x16xf32, #tpu.memory_space<vmem>>, %arg2: memref<9x32x16xf32, #tpu.memory_space<vmem>>, %arg3: memref<16x32xf32, #tpu.memory_space<vmem>>, %arg4: memref<1x32xf32, #tpu.memory_space<vmem>>, %arg5: memref<9x16xf32, #tpu.memory_space<vmem>>, %arg6: memref<9x16xf32, #tpu.memory_space<vmem>>, %arg7: memref<1x16xf32, #tpu.memory_space<vmem>>, %arg8: memref<1x16xf32, #tpu.memory_space<vmem>>, %arg9: memref<16x32xf32, #tpu.memory_space<vmem>>, %arg10: memref<16x32xf32, #tpu.memory_space<vmem>>, %arg11: memref<1x32xf32, #tpu.memory_space<vmem>>, %arg12: memref<2x1x32xf32, #tpu.memory_space<vmem>>, %arg13: memref<32x32xf32, #tpu.memory_space<vmem>>) attributes {dimension_semantics = [#tpu.dimension_semantics<parallel>], iteration_bounds = array<i64: 1>, scalar_prefetch = 0 : i64, scratch_operands = 0 : i64, tpu.core_type = #tpu.core_type<tc>, window_params = [{transform_indices = @transform_0, window_bounds = array<i64: 2, 1, 16>}, {transform_indices = @transform_1, window_bounds = array<i64: 9, 32, 16>}, {pipeline_mode = #tpu.pipeline_mode<synchronous>, transform_indices = @transform_2, window_bounds = array<i64: 16, 32>}, {pipeline_mode = #tpu.pipeline_mode<synchronous>, transform_indices = @transform_3, window_bounds = array<i64: 1, 32>}, {pipeline_mode = #tpu.pipeline_mode<synchronous>, transform_indices = @transform_4, window_bounds = array<i64: 9, 16>}, {pipeline_mode = #tpu.pipeline_mode<synchronous>, transform_indices = @transform_5, window_bounds = array<i64: 9, 16>}, {pipeline_mode = #tpu.pipeline_mode<synchronous>, transform_indices = @transform_6, window_bounds = array<i64: 1, 16>}, {pipeline_mode = #tpu.pipeline_mode<synchronous>, transform_indices = @transform_7, window_bounds = array<i64: 1, 16>}, {pipeline_mode = #tpu.pipeline_mode<synchronous>, transform_indices = @transform_8, window_bounds = array<i64: 16, 32>}, {pipeline_mode = #tpu.pipeline_mode<synchronous>, transform_indices = @transform_9, window_bounds = array<i64: 16, 32>}, {pipeline_mode = #tpu.pipeline_mode<synchronous>, transform_indices = @transform_10, window_bounds = array<i64: 1, 32>}, {transform_indices = @transform_11, window_bounds = array<i64: 2, 1, 32>}, {transform_indices = @transform_12, window_bounds = array<i64: 32, 32>}]} {
    %c0 = arith.constant 0 : index
    %c0_0 = arith.constant 0 : index
    %c0_1 = arith.constant 0 : index
    %0 = vector.load %arg1[%c0, %c0_0, %c0_1] : memref<2x1x16xf32, #tpu.memory_space<vmem>>, vector<2x1x16xf32>
    %1 = vector.shape_cast %0 : vector<2x1x16xf32> to vector<2x16xf32>
    %c0_2 = arith.constant 0 : index
    %c0_3 = arith.constant 0 : index
    %2 = vector.load %arg3[%c0_2, %c0_3] : memref<16x32xf32, #tpu.memory_space<vmem>>, vector<16x32xf32>
    %cst = arith.constant dense<0.000000e+00> : vector<2x32xf32>
    %3 = tpu.matmul %1, %2, %cst {dimension_numbers = #tpu.dot_dimension_numbers<[1], [0], [0], [1], [0, 0, 1, 1], [], []>} : vector<2x16xf32>, vector<16x32xf32>, vector<2x32xf32> -> vector<2x32xf32>
    %c0_4 = arith.constant 0 : index
    %c0_5 = arith.constant 0 : index
    %4 = vector.load %arg4[%c0_4, %c0_5] : memref<1x32xf32, #tpu.memory_space<vmem>>, vector<1x32xf32>
    %5 = vector.broadcast %4 : vector<1x32xf32> to vector<2x32xf32>
    %6 = arith.addf %3, %5 : vector<2x32xf32>
    %c0_6 = arith.constant 0 : index
    %c0_7 = arith.constant 0 : index
    %c0_8 = arith.constant 0 : index
    %7 = vector.load %arg12[%c0_6, %c0_7, %c0_8] : memref<2x1x32xf32, #tpu.memory_space<vmem>>, vector<2x1x32xf32>
    %8 = vector.shape_cast %7 : vector<2x1x32xf32> to vector<2x32xf32>
    %9 = vector.shape_cast %6 : vector<2x32xf32> to vector<2x1x32xf32>
    tpu.vector_store %arg12[%c0_6, %c0_7, %c0_8], %9 {strides = array<i32>} : memref<2x1x32xf32, #tpu.memory_space<vmem>>, vector<2x1x32xf32>,
    %cst_9 = arith.constant 0.000000e+00 : f32
    %10 = vector.broadcast %cst_9 : f32 to vector<32x16xf32>
    %cst_10 = arith.constant 0.000000e+00 : f32
    %11 = vector.broadcast %cst_10 : f32 to vector<32x16xf32>
    %c0_11 = arith.constant 0 : index
    %c0_12 = arith.constant 0 : index
    %c0_13 = arith.constant 0 : index
    %12 = vector.load %arg2[%c0_11, %c0_12, %c0_13] : memref<9x32x16xf32, #tpu.memory_space<vmem>>, vector<1x32x16xf32>
    %13 = vector.shape_cast %12 : vector<1x32x16xf32> to vector<32x16xf32>
    %c0_14 = arith.constant 0 : index
    %c0_15 = arith.constant 0 : index
    %14 = vector.load %arg5[%c0_14, %c0_15] : memref<9x16xf32, #tpu.memory_space<vmem>>, vector<1x16xf32>
    %15 = vector.broadcast %14 : vector<1x16xf32> to vector<32x16xf32>
    %16 = arith.mulf %13, %15 : vector<32x16xf32>
    %17 = arith.addf %10, %16 : vector<32x16xf32>
    %c0_16 = arith.constant 0 : index
    %c0_17 = arith.constant 0 : index
    %18 = vector.load %arg6[%c0_16, %c0_17] : memref<9x16xf32, #tpu.memory_space<vmem>>, vector<1x16xf32>
    %19 = vector.broadcast %18 : vector<1x16xf32> to vector<32x16xf32>
    %20 = arith.mulf %13, %19 : vector<32x16xf32>
    %21 = arith.addf %11, %20 : vector<32x16xf32>
    %c1 = arith.constant 1 : index
    %c0_18 = arith.constant 0 : index
    %c0_19 = arith.constant 0 : index
    %22 = vector.load %arg2[%c1, %c0_18, %c0_19] : memref<9x32x16xf32, #tpu.memory_space<vmem>>, vector<1x32x16xf32>
    %23 = vector.shape_cast %22 : vector<1x32x16xf32> to vector<32x16xf32>
    %c1_20 = arith.constant 1 : index
    %c0_21 = arith.constant 0 : index
    %24 = vector.load %arg5[%c1_20, %c0_21] : memref<9x16xf32, #tpu.memory_space<vmem>>, vector<1x16xf32>
    %25 = vector.broadcast %24 : vector<1x16xf32> to vector<32x16xf32>
    %26 = arith.mulf %23, %25 : vector<32x16xf32>
    %27 = arith.addf %17, %26 : vector<32x16xf32>
    %c1_22 = arith.constant 1 : index
    %c0_23 = arith.constant 0 : index
    %28 = vector.load %arg6[%c1_22, %c0_23] : memref<9x16xf32, #tpu.memory_space<vmem>>, vector<1x16xf32>
    %29 = vector.broadcast %28 : vector<1x16xf32> to vector<32x16xf32>
    %30 = arith.mulf %23, %29 : vector<32x16xf32>
    %31 = arith.addf %21, %30 : vector<32x16xf32>
    %c2 = arith.constant 2 : index
    %c0_24 = arith.constant 0 : index
    %c0_25 = arith.constant 0 : index
    %32 = vector.load %arg2[%c2, %c0_24, %c0_25] : memref<9x32x16xf32, #tpu.memory_space<vmem>>, vector<1x32x16xf32>
    %33 = vector.shape_cast %32 : vector<1x32x16xf32> to vector<32x16xf32>
    %c2_26 = arith.constant 2 : index
    %c0_27 = arith.constant 0 : index
    %34 = vector.load %arg5[%c2_26, %c0_27] : memref<9x16xf32, #tpu.memory_space<vmem>>, vector<1x16xf32>
    %35 = vector.broadcast %34 : vector<1x16xf32> to vector<32x16xf32>
    %36 = arith.mulf %33, %35 : vector<32x16xf32>
    %37 = arith.addf %27, %36 : vector<32x16xf32>
    %c2_28 = arith.constant 2 : index
    %c0_29 = arith.constant 0 : index
    %38 = vector.load %arg6[%c2_28, %c0_29] : memref<9x16xf32, #tpu.memory_space<vmem>>, vector<1x16xf32>
    %39 = vector.broadcast %38 : vector<1x16xf32> to vector<32x16xf32>
    %40 = arith.mulf %33, %39 : vector<32x16xf32>
    %41 = arith.addf %31, %40 : vector<32x16xf32>
    %c3 = arith.constant 3 : index
    %c0_30 = arith.constant 0 : index
    %c0_31 = arith.constant 0 : index
    %42 = vector.load %arg2[%c3, %c0_30, %c0_31] : memref<9x32x16xf32, #tpu.memory_space<vmem>>, vector<1x32x16xf32>
    %43 = vector.shape_cast %42 : vector<1x32x16xf32> to vector<32x16xf32>
    %c3_32 = arith.constant 3 : index
    %c0_33 = arith.constant 0 : index
    %44 = vector.load %arg5[%c3_32, %c0_33] : memref<9x16xf32, #tpu.memory_space<vmem>>, vector<1x16xf32>
    %45 = vector.broadcast %44 : vector<1x16xf32> to vector<32x16xf32>
    %46 = arith.mulf %43, %45 : vector<32x16xf32>
    %47 = arith.addf %37, %46 : vector<32x16xf32>
    %c3_34 = arith.constant 3 : index
    %c0_35 = arith.constant 0 : index
    %48 = vector.load %arg6[%c3_34, %c0_35] : memref<9x16xf32, #tpu.memory_space<vmem>>, vector<1x16xf32>
    %49 = vector.broadcast %48 : vector<1x16xf32> to vector<32x16xf32>
    %50 = arith.mulf %43, %49 : vector<32x16xf32>
    %51 = arith.addf %41, %50 : vector<32x16xf32>
    %c4 = arith.constant 4 : index
    %c0_36 = arith.constant 0 : index
    %c0_37 = arith.constant 0 : index
    %52 = vector.load %arg2[%c4, %c0_36, %c0_37] : memref<9x32x16xf32, #tpu.memory_space<vmem>>, vector<1x32x16xf32>
    %53 = vector.shape_cast %52 : vector<1x32x16xf32> to vector<32x16xf32>
    %c4_38 = arith.constant 4 : index
    %c0_39 = arith.constant 0 : index
    %54 = vector.load %arg5[%c4_38, %c0_39] : memref<9x16xf32, #tpu.memory_space<vmem>>, vector<1x16xf32>
    %55 = vector.broadcast %54 : vector<1x16xf32> to vector<32x16xf32>
    %56 = arith.mulf %53, %55 : vector<32x16xf32>
    %57 = arith.addf %47, %56 : vector<32x16xf32>
    %c4_40 = arith.constant 4 : index
    %c0_41 = arith.constant 0 : index
    %58 = vector.load %arg6[%c4_40, %c0_41] : memref<9x16xf32, #tpu.memory_space<vmem>>, vector<1x16xf32>
    %59 = vector.broadcast %58 : vector<1x16xf32> to vector<32x16xf32>
    %60 = arith.mulf %53, %59 : vector<32x16xf32>
    %61 = arith.addf %51, %60 : vector<32x16xf32>
    %c5 = arith.constant 5 : index
    %c0_42 = arith.constant 0 : index
    %c0_43 = arith.constant 0 : index
    %62 = vector.load %arg2[%c5, %c0_42, %c0_43] : memref<9x32x16xf32, #tpu.memory_space<vmem>>, vector<1x32x16xf32>
    %63 = vector.shape_cast %62 : vector<1x32x16xf32> to vector<32x16xf32>
    %c5_44 = arith.constant 5 : index
    %c0_45 = arith.constant 0 : index
    %64 = vector.load %arg5[%c5_44, %c0_45] : memref<9x16xf32, #tpu.memory_space<vmem>>, vector<1x16xf32>
    %65 = vector.broadcast %64 : vector<1x16xf32> to vector<32x16xf32>
    %66 = arith.mulf %63, %65 : vector<32x16xf32>
    %67 = arith.addf %57, %66 : vector<32x16xf32>
    %c5_46 = arith.constant 5 : index
    %c0_47 = arith.constant 0 : index
    %68 = vector.load %arg6[%c5_46, %c0_47] : memref<9x16xf32, #tpu.memory_space<vmem>>, vector<1x16xf32>
    %69 = vector.broadcast %68 : vector<1x16xf32> to vector<32x16xf32>
    %70 = arith.mulf %63, %69 : vector<32x16xf32>
    %71 = arith.addf %61, %70 : vector<32x16xf32>
    %c6 = arith.constant 6 : index
    %c0_48 = arith.constant 0 : index
    %c0_49 = arith.constant 0 : index
    %72 = vector.load %arg2[%c6, %c0_48, %c0_49] : memref<9x32x16xf32, #tpu.memory_space<vmem>>, vector<1x32x16xf32>
    %73 = vector.shape_cast %72 : vector<1x32x16xf32> to vector<32x16xf32>
    %c6_50 = arith.constant 6 : index
    %c0_51 = arith.constant 0 : index
    %74 = vector.load %arg5[%c6_50, %c0_51] : memref<9x16xf32, #tpu.memory_space<vmem>>, vector<1x16xf32>
    %75 = vector.broadcast %74 : vector<1x16xf32> to vector<32x16xf32>
    %76 = arith.mulf %73, %75 : vector<32x16xf32>
    %77 = arith.addf %67, %76 : vector<32x16xf32>
    %c6_52 = arith.constant 6 : index
    %c0_53 = arith.constant 0 : index
    %78 = vector.load %arg6[%c6_52, %c0_53] : memref<9x16xf32, #tpu.memory_space<vmem>>, vector<1x16xf32>
    %79 = vector.broadcast %78 : vector<1x16xf32> to vector<32x16xf32>
    %80 = arith.mulf %73, %79 : vector<32x16xf32>
    %81 = arith.addf %71, %80 : vector<32x16xf32>
    %c7 = arith.constant 7 : index
    %c0_54 = arith.constant 0 : index
    %c0_55 = arith.constant 0 : index
    %82 = vector.load %arg2[%c7, %c0_54, %c0_55] : memref<9x32x16xf32, #tpu.memory_space<vmem>>, vector<1x32x16xf32>
    %83 = vector.shape_cast %82 : vector<1x32x16xf32> to vector<32x16xf32>
    %c7_56 = arith.constant 7 : index
    %c0_57 = arith.constant 0 : index
    %84 = vector.load %arg5[%c7_56, %c0_57] : memref<9x16xf32, #tpu.memory_space<vmem>>, vector<1x16xf32>
    %85 = vector.broadcast %84 : vector<1x16xf32> to vector<32x16xf32>
    %86 = arith.mulf %83, %85 : vector<32x16xf32>
    %87 = arith.addf %77, %86 : vector<32x16xf32>
    %c7_58 = arith.constant 7 : index
    %c0_59 = arith.constant 0 : index
    %88 = vector.load %arg6[%c7_58, %c0_59] : memref<9x16xf32, #tpu.memory_space<vmem>>, vector<1x16xf32>
    %89 = vector.broadcast %88 : vector<1x16xf32> to vector<32x16xf32>
    %90 = arith.mulf %83, %89 : vector<32x16xf32>
    %91 = arith.addf %81, %90 : vector<32x16xf32>
    %c8 = arith.constant 8 : index
    %c0_60 = arith.constant 0 : index
    %c0_61 = arith.constant 0 : index
    %92 = vector.load %arg2[%c8, %c0_60, %c0_61] : memref<9x32x16xf32, #tpu.memory_space<vmem>>, vector<1x32x16xf32>
    %93 = vector.shape_cast %92 : vector<1x32x16xf32> to vector<32x16xf32>
    %c8_62 = arith.constant 8 : index
    %c0_63 = arith.constant 0 : index
    %94 = vector.load %arg5[%c8_62, %c0_63] : memref<9x16xf32, #tpu.memory_space<vmem>>, vector<1x16xf32>
    %95 = vector.broadcast %94 : vector<1x16xf32> to vector<32x16xf32>
    %96 = arith.mulf %93, %95 : vector<32x16xf32>
    %97 = arith.addf %87, %96 : vector<32x16xf32>
    %c8_64 = arith.constant 8 : index
    %c0_65 = arith.constant 0 : index
    %98 = vector.load %arg6[%c8_64, %c0_65] : memref<9x16xf32, #tpu.memory_space<vmem>>, vector<1x16xf32>
    %99 = vector.broadcast %98 : vector<1x16xf32> to vector<32x16xf32>
    %100 = arith.mulf %93, %99 : vector<32x16xf32>
    %101 = arith.addf %91, %100 : vector<32x16xf32>
    %c0_66 = arith.constant 0 : index
    %c0_67 = arith.constant 0 : index
    %102 = vector.load %arg7[%c0_66, %c0_67] : memref<1x16xf32, #tpu.memory_space<vmem>>, vector<1x16xf32>
    %103 = vector.broadcast %102 : vector<1x16xf32> to vector<32x16xf32>
    %104 = arith.addf %97, %103 : vector<32x16xf32>
    %c0_68 = arith.constant 0 : index
    %c0_69 = arith.constant 0 : index
    %105 = vector.load %arg8[%c0_68, %c0_69] : memref<1x16xf32, #tpu.memory_space<vmem>>, vector<1x16xf32>
    %106 = vector.broadcast %105 : vector<1x16xf32> to vector<32x16xf32>
    %107 = arith.addf %101, %106 : vector<32x16xf32>
    %c0_70 = arith.constant 0 : index
    %c0_71 = arith.constant 0 : index
    %108 = vector.load %arg9[%c0_70, %c0_71] : memref<16x32xf32, #tpu.memory_space<vmem>>, vector<16x32xf32>
    %cst_72 = arith.constant dense<0.000000e+00> : vector<32x32xf32>
    %109 = tpu.matmul %104, %108, %cst_72 {dimension_numbers = #tpu.dot_dimension_numbers<[1], [0], [0], [1], [0, 0, 1, 1], [], []>} : vector<32x16xf32>, vector<16x32xf32>, vector<32x32xf32> -> vector<32x32xf32>
    %c0_73 = arith.constant 0 : index
    %c0_74 = arith.constant 0 : index
    %110 = vector.load %arg10[%c0_73, %c0_74] : memref<16x32xf32, #tpu.memory_space<vmem>>, vector<16x32xf32>
    %cst_75 = arith.constant dense<0.000000e+00> : vector<32x32xf32>
    %111 = tpu.matmul %107, %110, %cst_75 {dimension_numbers = #tpu.dot_dimension_numbers<[1], [0], [0], [1], [0, 0, 1, 1], [], []>} : vector<32x16xf32>, vector<16x32xf32>, vector<32x32xf32> -> vector<32x32xf32>
    %112 = arith.addf %109, %111 : vector<32x32xf32>
    %c0_76 = arith.constant 0 : index
    %c0_77 = arith.constant 0 : index
    %113 = vector.load %arg11[%c0_76, %c0_77] : memref<1x32xf32, #tpu.memory_space<vmem>>, vector<1x32xf32>
    %114 = vector.broadcast %113 : vector<1x32xf32> to vector<32x32xf32>
    %115 = arith.addf %112, %114 : vector<32x32xf32>
    %c0_78 = arith.constant 0 : index
    %c0_79 = arith.constant 0 : index
    %116 = vector.load %arg13[%c0_78, %c0_79] : memref<32x32xf32, #tpu.memory_space<vmem>>, vector<32x32xf32>
    tpu.vector_store %arg13[%c0_78, %c0_79], %115 {strides = array<i32>} : memref<32x32xf32, #tpu.memory_space<vmem>>, vector<32x32xf32>,
    return
  }
  func.func @transform_0(%arg0: i32) -> (i32, i32, i32) {
    %c0_i32 = arith.constant 0 : i32
    %c0_i32_0 = arith.constant 0 : i32
    %c0_i32_1 = arith.constant 0 : i32
    return %arg0, %c0_i32, %c0_i32_0 : i32, i32, i32
  }
  func.func @transform_1(%arg0: i32) -> (i32, i32, i32) {
    %c0_i32 = arith.constant 0 : i32
    %c0_i32_0 = arith.constant 0 : i32
    %c0_i32_1 = arith.constant 0 : i32
    return %c0_i32, %arg0, %c0_i32_0 : i32, i32, i32
  }
  func.func @transform_2(%arg0: i32) -> (i32, i32) {
    %c0_i32 = arith.constant 0 : i32
    %c0_i32_0 = arith.constant 0 : i32
    %c0_i32_1 = arith.constant 0 : i32
    return %c0_i32, %c0_i32_0 : i32, i32
  }
  func.func @transform_3(%arg0: i32) -> (i32, i32) {
    %c0_i32 = arith.constant 0 : i32
    %c0_i32_0 = arith.constant 0 : i32
    %c0_i32_1 = arith.constant 0 : i32
    return %c0_i32, %c0_i32_0 : i32, i32
  }
  func.func @transform_4(%arg0: i32) -> (i32, i32) {
    %c0_i32 = arith.constant 0 : i32
    %c0_i32_0 = arith.constant 0 : i32
    %c0_i32_1 = arith.constant 0 : i32
    return %c0_i32, %c0_i32_0 : i32, i32
  }
  func.func @transform_5(%arg0: i32) -> (i32, i32) {
    %c0_i32 = arith.constant 0 : i32
    %c0_i32_0 = arith.constant 0 : i32
    %c0_i32_1 = arith.constant 0 : i32
    return %c0_i32, %c0_i32_0 : i32, i32
  }
  func.func @transform_6(%arg0: i32) -> (i32, i32) {
    %c0_i32 = arith.constant 0 : i32
    %c0_i32_0 = arith.constant 0 : i32
    %c0_i32_1 = arith.constant 0 : i32
    return %c0_i32, %c0_i32_0 : i32, i32
  }
  func.func @transform_7(%arg0: i32) -> (i32, i32) {
    %c0_i32 = arith.constant 0 : i32
    %c0_i32_0 = arith.constant 0 : i32
    %c0_i32_1 = arith.constant 0 : i32
    return %c0_i32, %c0_i32_0 : i32, i32
  }
  func.func @transform_8(%arg0: i32) -> (i32, i32) {
    %c0_i32 = arith.constant 0 : i32
    %c0_i32_0 = arith.constant 0 : i32
    %c0_i32_1 = arith.constant 0 : i32
    return %c0_i32, %c0_i32_0 : i32, i32
  }
  func.func @transform_9(%arg0: i32) -> (i32, i32) {
    %c0_i32 = arith.constant 0 : i32
    %c0_i32_0 = arith.constant 0 : i32
    %c0_i32_1 = arith.constant 0 : i32
    return %c0_i32, %c0_i32_0 : i32, i32
  }
  func.func @transform_10(%arg0: i32) -> (i32, i32) {
    %c0_i32 = arith.constant 0 : i32
    %c0_i32_0 = arith.constant 0 : i32
    %c0_i32_1 = arith.constant 0 : i32
    return %c0_i32, %c0_i32_0 : i32, i32
  }
  func.func @transform_11(%arg0: i32) -> (i32, i32, i32) {
    %c0_i32 = arith.constant 0 : i32
    %c0_i32_0 = arith.constant 0 : i32
    %c0_i32_1 = arith.constant 0 : i32
    return %arg0, %c0_i32, %c0_i32_0 : i32, i32, i32
  }
  func.func @transform_12(%arg0: i32) -> (i32, i32) {
    %c0_i32 = arith.constant 0 : i32
    %c0_i32_0 = arith.constant 0 : i32
    return %arg0, %c0_i32 : i32, i32
  }
}

</mosaic_0001>

<bundles_post_ra>
// kernel: tpu_custom_call.1
= control target key start
LH: loop header
LB: loop body
LE: loop exit
PB: predicated region body
PF: predicated region fallthrough
CT: control target
= control target key end

     0   :  { %18 = vsyncpa [#allocation3], 0  ;;  %v59_v2 = vlaneseq  ;;  %v895_v4 = vmov 0.0|0.0   ;;  %vm896_vm0 = vmmov 0   ;;  %v897_v6 = vmov 0.0   ;;  %s1332_s0 = inlined_call_operand.vmem [shape: f32[2,1,16], index: 0, kind: input, shape index: {}]   ;;  %s1333_s1 = inlined_call_operand.vmem [shape: f32[9,32,16], index: 1, kind: input, shape index: {}]   ;;  %s1334_s2 = inlined_call_operand.vmem [shape: f32[16,32], index: 2, kind: input, shape index: {}]   ;;  %s1335_s3 = inlined_call_operand.vmem [shape: f32[1,32], index: 3, kind: input, shape index: {}]   ;;  %s1336_s4 = inlined_call_operand.vmem [shape: f32[9,16], index: 4, kind: input, shape index: {}]   ;;  %s1337_s5 = inlined_call_operand.vmem [shape: f32[9,16], index: 5, kind: input, shape index: {}]   ;;  %s1338_s6 = inlined_call_operand.vmem [shape: f32[1,16], index: 6, kind: input, shape index: {}]   ;;  %s1339_s7 = inlined_call_operand.vmem [shape: f32[1,16], index: 7, kind: input, shape index: {}]   ;;  %s1340_s8 = inlined_call_operand.vmem [shape: f32[16,32], index: 8, kind: input, shape index: {}]   ;;  %s1341_s9 = inlined_call_operand.vmem [shape: f32[16,32], index: 9, kind: input, shape index: {}]   ;;  %s1342_s10 = inlined_call_operand.vmem [shape: f32[1,32], index: 10, kind: input, shape index: {}]   ;;  %s1343_s11 = inlined_call_operand.hbm [shape: f32[2,1,32], index: 11, kind: output, shape index: {0}]   ;;  %s1344_s12 = inlined_call_operand.hbm [shape: f32[32,32], index: 12, kind: output, shape index: {1}]  }
   0x1   :  { %v44_v0 = vld [vmem:[%s1334_s2] sm:$0xff]  ;;  %v45_v1 = vld [vmem:[%s1334_s2 + $0x8] sm:$0xff]  ;;  %822 = vmatprep.subr.bf16.mxu0 %v895_v4  ;;  %799 = vmatprep.mubr.msk.f32.mxu0 %vm896_vm0, %v897_v6  ;;  %v898_v9 = vmov 1966171168   ;;  %vm70_vm1 = vcmask 130048  }
   0x2   :  { %v473_v3 = vld [vmem:[%s1341_s9] sm:$0xff]  ;;  %v823_v5 = vpack.c.bf16 %v45_v1, %v44_v0  ;;  %v57_v10 = vunpack.c.l.s4 %v898_v9  ;;  %v60_v11 = vshrl.u32 %v59_v2, 7  ;;  %v474_v12 = vld [vmem:[%s1341_s9 + $0x8] sm:$0xff] }
   0x3   :  { %v42_v7 = vld [vmem:[%s1332_s0] sm:$0x1]  ;;  %v43_v8 = vld [vmem:[%s1332_s0 + $0x1] sm:$0x1]  ;;  %v472_v14 = vld [vmem:[%s1340_s8 + $0x8] sm:$0xff]  ;;  %v825_v15 = vpack.c.bf16 %v474_v12, %v473_v3 }
   0x4   :  { %v471_v13 = vld [vmem:[%s1340_s8] sm:$0xff]  ;;  %824 = vmatpush3.bf16.msra.mxu0 %v823_v5  ;;  %v55_v20 = vcombine.low %v42_v7, %v43_v8  ;;  %v58_v21 = vunpack.c.0.s8 %v57_v10  ;;  %v1072_v45 = vld [vmem:[%s1337_s5 + $0x8] ss:$0 sm:$0xff] }
   0x5   :  { %v829_v16 = vpack.c.bf16 %v472_v14, %v471_v13  ;;  %v171_v17 = vld [vmem:[%s1333_s1] sm:$0xff]  ;;  %826 = vmatprep.subr.bf16.mxu0 %v825_v15  ;;  %v1126_v0 = vld [vmem:[%s1336_s4 + $0x8] ss:$0 sm:$0xff] }
   0x6   :  { %v1000_v18 = vld [vmem:[%s1337_s5] ss:$0 sm:$0xff]  ;;  %v1009_v23 = vld [vmem:[%s1337_s5 + $0x1] ss:$0 sm:$0xff]  ;;  %v1017_v25 = vld [vmem:[%s1337_s5 + $0x2] ss:$0 sm:$0xff]  ;;  %v1029_v30 = vsub.s32 %v58_v21, %v60_v11 }
   0x7   :  { %v721_v19 = vld [vmem:[%s1333_s1 + $0x20] sm:$0xff]  ;;  %v193_v22 = vmul.f32 %v1000_v18, %v171_v17  ;;  %830 = vmatprep.subr.bf16.mxu1 %v829_v16  ;;  %v172_v1 = vld [vmem:[%s1333_s1 + $0x8] sm:$0xff] }
   0x8   :  { %v727_v24 = vld [vmem:[%s1333_s1 + $0x40] sm:$0xff]  ;;  %v224_v26 = vmul.f32 %v1009_v23, %v721_v19  ;;  %832 = vmatpush3.bf16.msra.mxu1 %v829_v16  ;;  %v62_v39 = vrot.slane %v55_v20, %v1029_v30  ;;  %v194_v5 = vmul.f32 %v1000_v18, %v172_v1  ;;  %v722_v6 = vld [vmem:[%s1333_s1 + $0x28] sm:$0xff] }
   0x9   :  { %v255_v27 = vmul.f32 %v1017_v25, %v727_v24  ;;  %v733_v28 = vld [vmem:[%s1333_s1 + $0x60] sm:$0xff]  ;;  %v728_v7 = vld [vmem:[%s1333_s1 + $0x48] sm:$0xff]  ;;  %v225_v11 = vmul.f32 %v1009_v23, %v722_v6 }
   0xa   :  { %v1027_v29 = vld [vmem:[%s1337_s5 + $0x3] ss:$0 sm:$0xff]  ;;  %v1037_v32 = vld [vmem:[%s1337_s5 + $0x4] ss:$0 sm:$0xff]  ;;  %v228_v34 = vadd.f32 %v224_v26, %v193_v22  ;;  %v1046_v36 = vld [vmem:[%s1337_s5 + $0x5] ss:$0 sm:$0xff]  ;;  %v69_v48 = vrot.slane %v62_v39, %v1029_v30  ;;  %v256_v12 = vmul.f32 %v1017_v25, %v728_v7 }
   0xb   :  { %v739_v31 = vld [vmem:[%s1333_s1 + $0x80] sm:$0xff]  ;;  %v286_v35 = vmul.f32 %v1027_v29, %v733_v28  ;;  %v734_v8 = vld [vmem:[%s1333_s1 + $0x68] sm:$0xff] }
   0xc   :  { %v745_v33 = vld [vmem:[%s1333_s1 + $0xa0] sm:$0xff]  ;;  %v259_v43 = vadd.f32 %v255_v27, %v228_v34  ;;  %v317_v44 = vmul.f32 %v1037_v32, %v739_v31  ;;  %800 = vmatmul.mubr.msk.f32.vlgmr.msra.gmra.mrb[0].mxu0 %vm70_vm1, %v69_v48  ;;  %v740_v13 = vld [vmem:[%s1333_s1 + $0x88] sm:$0xff]  ;;  %v287_v26 = vmul.f32 %v1027_v29, %v734_v8 }
   0xd   :  { %v751_v37 = vld [vmem:[%s1333_s1 + $0xc0] sm:$0xff]  ;;  %v348_v55 = vmul.f32 %v1046_v36, %v745_v33  ;;  %828 = vmatpush3.bf16.msra.mxu0 %v825_v15  ;;  %v758_v27 = vld [vmem:[%s1333_s1 + $0xe8] sm:$0xff] }
   0xe   :  { %v1054_v38 = vld [vmem:[%s1337_s5 + $0x6] ss:$0 sm:$0xff]  ;;  %v1063_v41 = vld [vmem:[%s1337_s5 + $0x7] ss:$0 sm:$0xff]  ;;  %v1077_v46 = vld [vmem:[%s1336_s4] ss:$0 sm:$0xff]  ;;  %v290_v54 = vadd.f32 %v286_v35, %v259_v43 }
   0xf   :  { %v757_v40 = vld [vmem:[%s1333_s1 + $0xe0] sm:$0xff]  ;;  %v180_v49 = vmul.f32 %v1077_v46, %v171_v17  ;;  %v379_v59 = vmul.f32 %v1054_v38, %v751_v37  ;;  %v746_v17 = vld [vmem:[%s1333_s1 + $0xa8] sm:$0xff]  ;;  %v181_v20 = vmul.f32 %v1077_v46, %v172_v1  ;;  %v173_v35 = vld [vmem:[%s1333_s1 + $0x10] sm:$0xff] }
  0x10   :  { %v763_v42 = vld [vmem:[%s1333_s1 + $0x100] sm:$0xff]  ;;  %v410_v60 = vmul.f32 %v1063_v41, %v757_v40  ;;  %v321_v2 = vadd.f32 %v317_v44, %v290_v54  ;;  %v723_v43 = vld [vmem:[%s1333_s1 + $0x30] sm:$0xff] }
  0x11   :  { %v1082_v47 = vld [vmem:[%s1336_s4 + $0x1] ss:$0 sm:$0xff]  ;;  %v1090_v51 = vld [vmem:[%s1336_s4 + $0x2] ss:$0 sm:$0xff]  ;;  %v1095_v52 = vld [vmem:[%s1336_s4 + $0x3] ss:$0 sm:$0xff]  ;;  %v441_v3 = vmul.f32 %v1072_v45, %v763_v42  ;;  %v428_v22 = vmul.f32 %v1126_v0, %v763_v42 }
  0x12   :  { %v211_v50 = vmul.f32 %v1082_v47, %v721_v19  ;;  %v1100_v53 = vld [vmem:[%s1336_s4 + $0x4] ss:$0 sm:$0xff]  ;;  %v242_v56 = vmul.f32 %v1090_v51, %v727_v24  ;;  %v1107_v57 = vld [vmem:[%s1336_s4 + $0x5] ss:$0 sm:$0xff]  ;;  %v1112_v58 = vld [vmem:[%s1336_s4 + $0x6] ss:$0 sm:$0xff]  ;;  %v273_v62 = vmul.f32 %v1095_v52, %v733_v28  ;;  %v352_v14 = vadd.f32 %v348_v55, %v321_v2 }
  0x13   :  { %v1121_v63 = vld [vmem:[%s1336_s4 + $0x7] ss:$0 sm:$0xff]  ;;  %v304_v4 = vmul.f32 %v1100_v53, %v739_v31  ;;  %v335_v10 = vmul.f32 %v1107_v57, %v745_v33  ;;  %v366_v15 = vmul.f32 %v1112_v58, %v751_v37  ;;  %v752_v19 = vld [vmem:[%s1333_s1 + $0xc8] sm:$0xff]  ;;  %v229_v24 = vadd.f32 %v225_v11, %v194_v5  ;;  %v729_v44 = vld [vmem:[%s1333_s1 + $0x50] sm:$0xff] }
  0x14   :  { %v215_v61 = vadd.f32 %v211_v50, %v180_v49  ;;  %v397_v16 = vmul.f32 %v1121_v63, %v757_v40  ;;  %v383_v28 = vadd.f32 %v379_v59, %v352_v14  ;;  %v318_v31 = vmul.f32 %v1037_v32, %v740_v13  ;;  %v764_v50 = vld [vmem:[%s1333_s1 + $0x108] sm:$0xff]  ;;  %v735_v1 = vld [vmem:[%s1333_s1 + $0x70] sm:$0xff] }
  0x15   :  { %v212_v33 = vmul.f32 %v1082_v47, %v722_v6  ;;  %v243_v34 = vmul.f32 %v1090_v51, %v728_v7  ;;  %v260_v39 = vadd.f32 %v256_v12, %v229_v24  ;;  %v349_v40 = vmul.f32 %v1046_v36, %v746_v17  ;;  %v741_v11 = vld [vmem:[%s1333_s1 + $0x90] sm:$0xff] }
  0x16   :  { %v246_v9 = vadd.f32 %v242_v56, %v215_v61  ;;  %v380_v42 = vmul.f32 %v1054_v38, %v752_v19  ;;  %v414_v48 = vadd.f32 %v410_v60, %v383_v28  ;;  %v411_v49 = vmul.f32 %v1063_v41, %v758_v27  ;;  %v1185_v56 = vld [vmem:[%s1339_s7] ss:$0 sm:$0xff] }
  0x17   :  { %v216_v54 = vadd.f32 %v212_v33, %v181_v20  ;;  %v274_v55 = vmul.f32 %v1095_v52, %v734_v8  ;;  %v291_v61 = vadd.f32 %v287_v26, %v260_v39  ;;  %v195_v60 = vmul.f32 %v1000_v18, %v173_v35 }
  0x18   :  { %v277_v21 = vadd.f32 %v273_v62, %v246_v9  ;;  %v305_v62 = vmul.f32 %v1100_v53, %v740_v13  ;;  %v445_v2 = vadd.f32 %v441_v3, %v414_v48  ;;  %v226_v5 = vmul.f32 %v1009_v23, %v723_v43 }
  0x19   :  { %v257_v6 = vmul.f32 %v1017_v25, %v729_v44  ;;  %v322_v8 = vadd.f32 %v318_v31, %v291_v61  ;;  %v442_v9 = vmul.f32 %v1072_v45, %v764_v50 }
  0x1a   :  { %v308_v37 = vadd.f32 %v304_v4, %v277_v21  ;;  %v247_v4 = vadd.f32 %v243_v34, %v216_v54 }
  0x1c   :  { %v339_v59 = vadd.f32 %v335_v10, %v308_v37  ;;  %v336_v10 = vmul.f32 %v1107_v57, %v746_v17 }
  0x1e   :  { %v370_v7 = vadd.f32 %v366_v15, %v339_v59 }
  0x1f   :  { %19 = vsyncpa [#allocation5], 0  ;;  %v467_v12 = vadd.f32 %v1185_v56, %v445_v2  ;;  %v278_v13 = vadd.f32 %v274_v55, %v247_v4  ;;  %v230_v3 = vadd.f32 %v226_v5, %v195_v60  ;;  %v288_v14 = vmul.f32 %v1027_v29, %v735_v1  ;;  %v747_v17 = vld [vmem:[%s1333_s1 + $0xb0] sm:$0xff]  ;;  %v1210_v26 = vld [vmem:[%s1338_s6] ss:$0 sm:$0xff]  ;;  %s899_s2 = smov [#allocation2]  }
  0x20   :  { %v401_v20 = vadd.f32 %v397_v16, %v370_v7  ;;  %v353_v21 = vadd.f32 %v349_v40, %v322_v8  ;;  %v367_v15 = vmul.f32 %v1112_v58, %v752_v19  ;;  %v398_v24 = vmul.f32 %v1121_v63, %v758_v27  ;;  %v753_v27 = vld [vmem:[%s1333_s1 + $0xd0] sm:$0xff]  ;;  %v736_v8 = vld [vmem:[%s1333_s1 + $0x78] sm:$0xff]  ;;  %s690_s13 = sshll.u32 %s899_s2, 4  ;;  %s691_s13 = int_to_ptr.vmem [resolvable:$true] %s690_s13 }
  0x21   :  { %806 = vmatprep.mubr.msk.f32.mxu0 %vm70_vm1, %v467_v12  ;;  %v309_v28 = vadd.f32 %v305_v62, %v278_v13  ;;  %v261_v31 = vadd.f32 %v257_v6, %v230_v3  ;;  %v319_v16 = vmul.f32 %v1037_v32, %v741_v11  ;;  %v182_v33 = vmul.f32 %v1077_v46, %v173_v35  ;;  %v759_v37 = vld [vmem:[%s1333_s1 + $0xf0] sm:$0xff]  ;;  %s847_s14 = scalar_lea.vmem %s691_s13, 32  ;;  %p852_p1 = scmp.lt.s32.totalorder %s691_s13, %s691_s13 }
  0x22   :  { %v432_v19 = vadd.f32 %v428_v22, %v401_v20  ;;  %v384_v34 = vadd.f32 %v380_v42, %v353_v21  ;;  %v213_v39 = vmul.f32 %v1082_v47, %v723_v43  ;;  %v244_v40 = vmul.f32 %v1090_v51, %v729_v44  ;;  %v174_v22 = vld [vmem:[%s1333_s1 + $0x18] sm:$0xff]  ;;  %p848_p0 = scmp.ne.s32.totalorder %s691_s13, %s847_s14  ;;  %p853_p2 = scmp.lt.s32.totalorder %s847_s14, %s847_s14 }
  0x23   :  { %v340_v48 = vadd.f32 %v336_v10, %v309_v28  ;;  %v429_v54 = vmul.f32 %v1126_v0, %v764_v50  ;;  %v292_v55 = vadd.f32 %v288_v14, %v261_v31  ;;  %v350_v35 = vmul.f32 %v1046_v36, %v747_v17  ;;  %v724_v43 = vld [vmem:[%s1333_s1 + $0x38] sm:$0xff] }
  0x24   :  { %v456_v42 = vadd.f32 %v1210_v26, %v432_v19  ;;  %v415_v59 = vadd.f32 %v411_v49, %v384_v34  ;;  %v217_v61 = vadd.f32 %v213_v39, %v182_v33  ;;  %v275_v62 = vmul.f32 %v1095_v52, %v735_v1  ;;  %v730_v44 = vld [vmem:[%s1333_s1 + $0x58] sm:$0xff]  ;;  %v765_v49 = vld [vmem:[%s1333_s1 + $0x110] sm:$0xff]  ;;  %p854_p3 = por %p853_p2, %p852_p1 }
  0x25   :  { %v371_v50 = vadd.f32 %v367_v15, %v340_v48  ;;  %v323_v60 = vadd.f32 %v319_v16, %v292_v55  ;;  %v381_v2 = vmul.f32 %v1054_v38, %v753_v27  ;;  %v412_v4 = vmul.f32 %v1063_v41, %v759_v37  ;;  %v742_v14 = vld [vmem:[%s1333_s1 + $0x98] sm:$0xff] }
  0x26   :  { %816 = vmatprep.mubr.msk.f32.mxu1 %vm70_vm1, %v456_v42  ;;  %v446_v1 = vadd.f32 %v442_v9, %v415_v59  ;;  %v248_v5 = vadd.f32 %v244_v40, %v217_v61  ;;  %v306_v6 = vmul.f32 %v1100_v53, %v741_v11  ;;  %v196_v7 = vmul.f32 %v1000_v18, %v174_v22  ;;  %v748_v16 = vld [vmem:[%s1333_s1 + $0xb8] sm:$0xff]  ;;  %p855_p4 = pnand %p854_p3, %p848_p0 }
  0x27   :  { %v402_v10 = vadd.f32 %v398_v24, %v371_v50  ;;  %v354_v12 = vadd.f32 %v350_v35, %v323_v60  ;;  %v227_v13 = vmul.f32 %v1009_v23, %v724_v43  ;;  %v258_v3 = vmul.f32 %v1017_v25, %v730_v44  ;;  %v754_v40 = vld [vmem:[%s1333_s1 + $0xd8] sm:$0xff] }
  0x28   :  { %v468_v9 = vadd.f32 %v1185_v56, %v446_v1  ;;  %v443_v11 = vmul.f32 %v1072_v45, %v765_v49  ;;  %v279_v20 = vadd.f32 %v275_v62, %v248_v5  ;;  %v337_v18 = vmul.f32 %v1107_v57, %v747_v17 }
  0x29   :  { %v433_v21 = vadd.f32 %v429_v54, %v402_v10  ;;  %v385_v15 = vadd.f32 %v381_v2, %v354_v12  ;;  %v231_v28 = vadd.f32 %v227_v13, %v196_v7  ;;  %v289_v24 = vmul.f32 %v1027_v29, %v736_v8 }
  0x2a   :  { %807 = vmatmul.mubr.msk.f32.vlgmr.msra.gmra.mrb[2].mxu0 %vm70_vm1, %v468_v9  ;;  %v310_v23 = vadd.f32 %v306_v6, %v279_v20  ;;  %v368_v25 = vmul.f32 %v1112_v58, %v753_v27  ;;  %v320_v31 = vmul.f32 %v1037_v32, %v742_v14  ;;  %v183_v34 = vmul.f32 %v1077_v46, %v174_v22 }
  0x2b   :  { %v457_v33 = vadd.f32 %v1210_v26, %v433_v21  ;;  %v416_v19 = vadd.f32 %v412_v4, %v385_v15  ;;  %v262_v17 = vadd.f32 %v258_v3, %v231_v28  ;;  %v399_v29 = vmul.f32 %v1121_v63, %v759_v37  ;;  %v760_v37 = vld [vmem:[%s1333_s1 + $0xf8] sm:$0xff] }
  0x2c   :  { %v341_v39 = vadd.f32 %v337_v18, %v310_v23  ;;  %v214_v27 = vmul.f32 %v1082_v47, %v724_v43  ;;  %v245_v32 = vmul.f32 %v1090_v51, %v730_v44  ;;  %v351_v55 = vmul.f32 %v1046_v36, %v748_v16  ;;  %v766_v36 = vld [vmem:[%s1333_s1 + $0x118] sm:$0xff] }
  0x2d   :  { %817 = vmatmul.mubr.msk.f32.vlgmr.msra.gmra.mrb[0].mxu1 %vm70_vm1, %v457_v33  ;;  %v447_v48 = vadd.f32 %v443_v11, %v416_v19  ;;  %v293_v54 = vadd.f32 %v289_v24, %v262_v17  ;;  %v430_v46 = vmul.f32 %v1126_v0, %v765_v49  ;;  %v276_v42 = vmul.f32 %v1095_v52, %v736_v8 }
  0x2e   :  { %v372_v35 = vadd.f32 %v368_v25, %v341_v39  ;;  %v218_v22 = vadd.f32 %v214_v27, %v183_v34  ;;  %v382_v51 = vmul.f32 %v1054_v38, %v754_v40  ;;  %v307_v43 = vmul.f32 %v1100_v53, %v742_v14 }
  0x2f   :  { %v469_v47 = vadd.f32 %v1185_v56, %v447_v48  ;;  %v324_v59 = vadd.f32 %v320_v31, %v293_v54  ;;  %v413_v50 = vmul.f32 %v1063_v41, %v760_v37  ;;  %v338_v2 = vmul.f32 %v1107_v57, %v748_v16 }
  0x30   :  { %v403_v61 = vadd.f32 %v399_v29, %v372_v35  ;;  %v249_v62 = vadd.f32 %v245_v32, %v218_v22  ;;  %v444_v38 = vmul.f32 %v1072_v45, %v766_v36  ;;  %v369_v5 = vmul.f32 %v1112_v58, %v754_v40  ;;  %v717_v58 = vld [vmem:[%s1335_s3] ss:$0 sm:$0xff] }
  0x31   :  { %809 = vmatprep.mubr.msk.f32.mxu0 %vm70_vm1, %v469_v47  ;;  %v355_v44 = vadd.f32 %v351_v55, %v324_v59  ;;  %v400_v7 = vmul.f32 %v1121_v63, %v760_v37  ;;  %v431_v10 = vmul.f32 %v1126_v0, %v766_v36  ;;  %vm168_vm2 = vcmask 253952  }
  0x32   :  { %v434_v60 = vadd.f32 %v430_v46, %v403_v61  ;;  %v280_v52 = vadd.f32 %v276_v42, %v249_v62 }
  0x33   :  { %v386_v4 = vadd.f32 %v382_v51, %v355_v44 }
  0x34   :  { %v458_v49 = vadd.f32 %v1210_v26, %v434_v60  ;;  %v311_v1 = vadd.f32 %v307_v43, %v280_v52 }
  0x35   :  { %v417_v6 = vadd.f32 %v413_v50, %v386_v4 }
  0x36   :  { %819 = vmatprep.mubr.msk.f32.mxu1 %vm70_vm1, %v458_v49  ;;  %v342_v53 = vadd.f32 %v338_v2, %v311_v1 }
  0x37   :  { %v448_v8 = vadd.f32 %v444_v38, %v417_v6 }
  0x38   :  { %v373_v41 = vadd.f32 %v369_v5, %v342_v53 }
  0x39   :  { %v470_v57 = vadd.f32 %v1185_v56, %v448_v8 }
  0x3a   :  { %v404_v12 = vadd.f32 %v400_v7, %v373_v41 }
  0x3b   :  { %810 = vmatmul.mubr.msk.f32.gmra.mrb[4].mxu0 %vm70_vm1, %v470_v57 }
  0x3c   :  { %v435_v45 = vadd.f32 %v431_v10, %v404_v12 }
  0x3e   :  { %v459_v13 = vadd.f32 %v1210_v26, %v435_v45 }
  0x40   :  { %820 = vmatmul.mubr.msk.f32.gmra.mrb[2].mxu1 %vm70_vm1, %v459_v13 }
  0xdf   :  { %v139_v3 = vpop.f32.mrb[0].mxu0 }
  0xe0   :  { %v140_v63 = vadd.f32 %v717_v58, %v139_v3  ;;  %v801_v14 = vpop.f32.mrb[1].mxu0 }
  0xe2   :  { %v150_v9 = vrot.slane %v140_v63, %v1029_v30 }
  0xe4   :  { %v151_v0 = vcombine.high %v150_v9, %v150_v9  ;;  %v158_v56 = vrot.slane %v150_v9, %v1029_v30 }
  0xe6   :  { %v165_v26 = vrot.slane %v151_v0, %v1029_v30  ;;  %169 = vst.msk [vmem:[#allocation2] sm:$0x1] %vm168_vm2, %v158_v56 }
  0xe8   :  { %170 = vst.msk [vmem:[#allocation2 + $0x1] sm:$0x1] %vm168_vm2, %v165_v26 }
  0xe9   :  { %858 = shalt.err (!%p855_p4)
}
  0xea   :  { %s859_s5 = scalar_lea.hbm %s1343_s11, 32 }
  0xeb   :  { %p860_p5 = scmp.ne.s32.totalorder %s1343_s11, %s859_s5  ;;  %p863_p6 = scmp.lt.u32.totalorder %s859_s5, %s1343_s11 }
  0xed   :  { %p865_p7 = pnand %p863_p6, %p860_p5 }
  0xef   :  { %868 = shalt.err (!%p865_p7)
}
  0xf0   :  { %s900_s0 = smov 16   ;;  %s901_s19 = smov 1   ;;  %v779_v18 = vld [vmem:[%s1342_s10] ss:$0 sm:$0xff]  ;;  %vm680_vm3 = vcmask 261120  }
  0xf1   :  { %696 = dma.vmem_to_hbm [thread:$0]  %s691_s13, 32, %s1343_s11, [#allocation3], %s900_s0, %s900_s0, %s901_s19  }
  0xf2   :  { %s902_s11 = smov [#allocation4]  }
  0xf3   :  { %s702_s22 = sshll.u32 %s902_s11, 4  ;;  %s703_s22 = int_to_ptr.vmem [resolvable:$true] %s702_s22 }
  0xf4   :  { %s869_s10 = scalar_lea.vmem %s703_s22, 512  ;;  %p874_p9 = scmp.lt.s32.totalorder %s703_s22, %s703_s22 }
  0xf5   :  { %p870_p8 = scmp.ne.s32.totalorder %s703_s22, %s869_s10  ;;  %p875_p10 = scmp.lt.s32.totalorder %s869_s10, %s869_s10 }
  0xf7   :  { %p876_p11 = por %p875_p10, %p874_p9 }
  0xf9   :  { %p877_p12 = pnand %p876_p11, %p870_p8 }
  0xfd   :  { %v808_v30 = vpop.f32.mrb[2].mxu0 }
  0xfe   :  { %v553_v11 = vpop.f32.mrb[3].mxu0 }
 0x100   :  { %v818_v20 = vpop.f32.mrb[0].mxu1 }
 0x101   :  { %v656_v21 = vadd.f32 %v818_v20, %v808_v30  ;;  %v650_v15 = vpop.f32.mrb[1].mxu1 }
 0x102   :  { %v651_v28 = vadd.f32 %v650_v15, %v553_v11 }
 0x103   :  { %v677_v24 = vadd.f32 %v779_v18, %v656_v21 }
 0x104   :  { %v676_v23 = vadd.f32 %v779_v18, %v651_v28 }
 0x105   :  { %682 = vst.msk [vmem:[#allocation4 + $0x8] sm:$0xff] %vm680_vm3, %v677_v24 }
 0x106   :  { %681 = vst.msk [vmem:[#allocation4] sm:$0xff] %vm680_vm3, %v676_v23 }
 0x10e   :  { %v811_v25 = vpop.f32.mrb[4].mxu0 }
 0x10f   :  { %v563_v31 = vpop.f32.mrb[5].mxu0 }
 0x113   :  { %v821_v16 = vpop.f32.mrb[2].mxu1 }
 0x114   :  { %v666_v33 = vadd.f32 %v821_v16, %v811_v25  ;;  %v660_v19 = vpop.f32.mrb[3].mxu1 }
 0x115   :  { %v661_v17 = vadd.f32 %v660_v19, %v563_v31 }
 0x116   :  { %v679_v34 = vadd.f32 %v779_v18, %v666_v33 }
 0x117   :  { %v678_v39 = vadd.f32 %v779_v18, %v661_v17 }
 0x118   :  { %684 = vst.msk [vmem:[#allocation4 + $0x18] sm:$0xff] %vm680_vm3, %v679_v34 }
 0x119   :  { %683 = vst.msk [vmem:[#allocation4 + $0x10] sm:$0xff] %vm680_vm3, %v678_v39 }
 0x11a   :  { %880 = shalt.err (!%p877_p12)
}
 0x11b   :  { %s881_s25 = scalar_lea.hbm %s1344_s12, 512 }
 0x11c   :  { %p882_p13 = scmp.ne.s32.totalorder %s1344_s12, %s881_s25  ;;  %p885_p0 = scmp.lt.u32.totalorder %s881_s25, %s1344_s12 }
 0x11e   :  { %p887_p1 = pnand %p885_p0, %p882_p13 }
 0x120   :  { %890 = shalt.err (!%p887_p1)
}
 0x121   :  { %s903_s29 = smov 128   ;;  %s904_s4 = smov 8  }
 0x122   :  { %708 = dma.vmem_to_hbm [thread:$0]  %s703_s22, 512, %s1344_s12, [#allocation5], %s903_s29, %s903_s29, %s904_s4  }
 0x123   :  { %891 = dma.done.wait [#allocation3], 32  }
 0x124   :  { %892 = vsyncadd [#allocation3], 4294967264 }
 0x125   :  { %893 = dma.done.wait [#allocation5], 512  }
 0x126   :  { %894 = vsyncadd [#allocation5], 4294966784 }
 0x127   :  { %715 = vsyncpa [#allocation3], 1 }
 0x128   :  { %716 = vsyncpa [#allocation5], 1 }

</bundles_post_ra>
